<compile_context>
chip_gen: v6e
topology: v6e:2x2x1
jax: 0.10.0
libtpu: 0.0.40
codegen_flags: <defaults>
</compile_context>

<pallas_src>
import jax
import jax.numpy as jnp
from jax.experimental import pallas as pl
from jax.experimental.pallas import tpu as pltpu
from math import sqrt
from typing import NamedTuple

# SELU constants (match torch.nn.SELU), scale folded into both branches.
_SELU_ALPHA = 1.6732632423543772
_SELU_SCALE = 1.0507009873554805
_SELU_SCALE_ALPHA = _SELU_SCALE * _SELU_ALPHA

_LANE = 128      # lane width: feature dims padded to multiples of this
_SUBLANE = 16    # sublane alignment (bf16 packs 16 rows per vreg)
_MIB = 1024 * 1024


def _selu(x):
    # scale folded into the branches (one less full-tile vmul per layer on the VPU;
    # exp() lands in the EUP slot). Elementwise math stays in f32 (v5e-safe).
    return jnp.where(x > 0.0, _SELU_SCALE * x, _SELU_SCALE_ALPHA * jnp.exp(x) - _SELU_SCALE_ALPHA)


def _round_up(n, m):
    return ((n + m - 1) // m) * m


def _cdiv(a, b):
    return (a + b - 1) // b


def _vmem_capacity_bytes():
    try:
        return int(pltpu.get_tpu_info().vmem_capacity_bytes)
    except Exception:
        return 128 * _MIB  # conservative fallback (v5e/v6e-sized VMEM)


def fc_module_kernel(x_ref, w1_ref, b1_ref, w2_ref, b2_ref, o_ref):
    # fc_block 1: Linear -> SELU -> AlphaDropout (eval mode => identity)
    h = jnp.dot(x_ref[...], w1_ref[...], preferred_element_type=jnp.float32)
    h = _selu(h + b1_ref[...])
    # TODO(synk): training-mode AlphaDropout (stochastic alpha-masking via pltpu.prng_*) not implemented; eval == identity.
    # fc_block 2: Linear -> SELU -> AlphaDropout (eval mode => identity)
    y = jnp.dot(h.astype(w2_ref.dtype), w2_ref[...], preferred_element_type=jnp.float32)
    y = _selu(y + b2_ref[...])
    o_ref[...] = y.astype(o_ref.dtype)


class FCParams(NamedTuple):
    w1: jax.Array   # (Dp,  H1p) bf16, zero-padded
    b1: jax.Array   # (1,   H1p) f32,  zero-padded
    w2: jax.Array   # (H1p, H2p) bf16, zero-padded
    b2: jax.Array   # (1,   H2p) f32,  zero-padded
    d_in: int
    h1: int
    h2: int


def prepare_params(w1, b1, w2, b2):
    """Pad feature dims to 128-lane multiples and cast weights to bf16 ONCE at init
    (hoisted out of the per-call wrapper so forward passes do no weight re-padding in HBM)."""
    D_in, H1 = w1.shape
    H2 = w2.shape[1]
    assert b1.shape == (1, H1) and w2.shape == (H1, H2) and b2.shape == (1, H2)
    Dp, H1p, H2p = (_round_up(d, _LANE) for d in (D_in, H1, H2))
    w1_p = jnp.zeros((Dp, H1p), jnp.bfloat16).at[:D_in, :H1].set(w1.astype(jnp.bfloat16))
    w2_p = jnp.zeros((H1p, H2p), jnp.bfloat16).at[:H1, :H2].set(w2.astype(jnp.bfloat16))
    # Biases stay f32 (bias-add + SELU run in f32). Padded lanes are exact zeros and
    # SELU(0) == 0, so padding propagates as zeros through both layers.
    b1_p = jnp.zeros((1, H1p), jnp.float32).at[:, :H1].set(b1.astype(jnp.float32))
    b2_p = jnp.zeros((1, H2p), jnp.float32).at[:, :H2].set(b2.astype(jnp.float32))
    return FCParams(w1_p, b1_p, w2_p, b2_p, D_in, H1, H2)


def _vmem_bytes_needed(TB, Dp, H1p, H2p, out_itemsize):
    x_tile = TB * Dp * 2                    # bf16 input tile
    out_tile = TB * H2p * out_itemsize
    weights = (Dp * H1p + H1p * H2p) * 2 + (H1p + H2p) * 4
    inter = TB * H1p * (4 + 2)              # f32 intermediate h + its bf16 cast
    # x/out double-buffered; weights counted 2x (conservative: default buffer depth).
    return 2 * x_tile + 2 * out_tile + 2 * weights + inter + 2 * _MIB


def _choose_batch_tile(B, block_b, Dp, H1p, H2p, out_itemsize, vmem_cap):
    # cdiv-based tiling: avoids the worst-case ~2x padding of round_up(B, TB).
    n_tiles = _cdiv(B, block_b)
    if n_tiles < 2 and B > _SUBLANE:
        n_tiles = 2          # give megacore's second TensorCore a tile to work on
    TB = _round_up(_cdiv(B, n_tiles), _SUBLANE)
    # Shrink the batch tile until the (conservative) footprint fits the VMEM budget.
    while TB > _SUBLANE and _vmem_bytes_needed(TB, Dp, H1p, H2p, out_itemsize) > vmem_cap:
        TB = _round_up(TB // 2, _SUBLANE)
    n_tiles = _cdiv(B, TB)
    return TB, n_tiles


def fc_module_forward(x, params: FCParams, *, block_b=None, out_dtype=jnp.float32):
    """x: (B, D_in) f32; params: FCParams from prepare_params(). Returns (B, H2) out_dtype."""
    B, D_in = x.shape
    assert D_in == params.d_in
    Dp, H1p = params.w1.shape
    H2p = params.w2.shape[1]
    out_itemsize = jnp.dtype(out_dtype).itemsize

    vmem_capacity = _vmem_capacity_bytes()
    # Usable budget: ~56 MiB on 64 MiB parts (v7x), ~100 MiB on 128 MiB parts (v5e/v6e).
    vmem_cap = min(vmem_capacity - 8 * _MIB, 100 * _MIB)
    if block_b is None:
        block_b = 256 if vmem_capacity <= 64 * _MIB else 512   # smaller default tile on v7x

    TB, n_tiles = _choose_batch_tile(B, block_b, Dp, H1p, H2p, out_itemsize, vmem_cap)
    Bp = n_tiles * TB

    need = _vmem_bytes_needed(TB, Dp, H1p, H2p, out_itemsize)
    if need > vmem_cap:
        # TODO(synk): add a K/N-tiled accumulator path (trailing "arbitrary" grid axis over D_in/H1,
        # f32 VMEM accumulator with pl.when init/finalize) for weights too large to stay VMEM-resident.
        raise NotImplementedError("FC weights too large for the VMEM-resident fused kernel on this TPU")
    vmem_limit = int(min(max(int(need * 1.25), 32 * _MIB), vmem_cap))

    # Per-call activation padding only (weights were padded once in prepare_params).
    x_p = jnp.zeros((Bp, Dp), jnp.bfloat16).at[:B, :D_in].set(x.astype(jnp.bfloat16))

    cost = pl.CostEstimate(
        flops=2 * Bp * (Dp * H1p + H1p * H2p),
        transcendentals=Bp * (H1p + H2p),
        bytes_accessed=(x_p.size * 2 + params.w1.size * 2 + params.w2.size * 2
                        + params.b1.size * 4 + params.b2.size * 4 + Bp * H2p * out_itemsize),
    )

    def build(single_buffer_weights):
        if single_buffer_weights:
            # Constant index_map => DMA'd once; single buffer halves resident-weight VMEM.
            def wspec(shape):
                return pl.BlockSpec(shape, lambda i: (0, 0),
                                    pipeline_mode=pl.Buffered(buffer_count=1))
        else:
            def wspec(shape):
                return pl.BlockSpec(shape, lambda i: (0, 0))
        return pl.pallas_call(
            fc_module_kernel,
            out_shape=jax.ShapeDtypeStruct((Bp, H2p), out_dtype),
            grid=(n_tiles,),
            in_specs=[
                pl.BlockSpec((TB, Dp), lambda i: (i, 0)),   # x: tiled + double-buffered over batch
                wspec((Dp, H1p)),                           # w1: VMEM-resident across tiles
                wspec((1, H1p)),                            # b1
                wspec((H1p, H2p)),                          # w2: VMEM-resident across tiles
                wspec((1, H2p)),                            # b2
            ],
            out_specs=pl.BlockSpec((TB, H2p), lambda i: (i, 0)),
            compiler_params=pltpu.CompilerParams(
                dimension_semantics=("parallel",),          # batch tiles independent -> split across TCs
                vmem_limit_bytes=vmem_limit,
            ),
            cost_estimate=cost,
        )

    args = (x_p, params.w1, params.b1, params.w2, params.b2)
    try:
        out_p = build(single_buffer_weights=True)(*args)
    except Exception:
        # pipeline_mode=pl.Buffered(1) not supported on this JAX/libtpu build: default buffering.
        out_p = build(single_buffer_weights=False)(*args)

    # Strip the lane/batch padding added in the wrapper.
    return out_p[:B, :params.h2]


def init_params(key, input_dim, hidden_dim_1, hidden_dim_2):
    """Deterministic init matching FCModule.selu_init:
    weights ~ Normal(0, sqrt(1/fan_in)); biases use PyTorch Linear default
    Uniform(-1/sqrt(fan_in), 1/sqrt(fan_in))."""
    k1, k2, k3, k4 = jax.random.split(key, 4)
    # PyTorch stores Linear weight as (out, in); we store transposed (in, out).
    w1 = jax.random.normal(k1, (input_dim, hidden_dim_1), jnp.float32) * sqrt(1.0 / input_dim)
    b1 = jax.random.uniform(
        k2, (1, hidden_dim_1), jnp.float32,
        minval=-1.0 / sqrt(input_dim), maxval=1.0 / sqrt(input_dim))
    w2 = jax.random.normal(k3, (hidden_dim_1, hidden_dim_2), jnp.float32) * sqrt(1.0 / hidden_dim_1)
    b2 = jax.random.uniform(
        k4, (1, hidden_dim_2), jnp.float32,
        minval=-1.0 / sqrt(hidden_dim_1), maxval=1.0 / sqrt(hidden_dim_1))
    return w1, b1, w2, b2


if __name__ == "__main__":
    key = jax.random.PRNGKey(0)
    k_x, k_p = jax.random.split(key)

    B = 8
    input_dim, hidden_dim_1, hidden_dim_2 = 32, 64, 32

    x = jax.random.normal(k_x, (B, input_dim), jnp.float32)
    w1, b1, w2, b2 = init_params(k_p, input_dim, hidden_dim_1, hidden_dim_2)
    params = prepare_params(w1, b1, w2, b2)   # pad + cast once (not per forward)

    out = jax.block_until_ready(fc_module_forward(x, params))
    assert out.shape == (B, hidden_dim_2)

    # Reference with matching bf16 matmul operands / f32 accumulation + f32 SELU.
    xb, w1b, w2b = (a.astype(jnp.bfloat16) for a in (x, w1, w2))
    h_ref = _selu(jnp.dot(xb, w1b, preferred_element_type=jnp.float32) + b1)
    y_ref = _selu(jnp.dot(h_ref.astype(jnp.bfloat16), w2b, preferred_element_type=jnp.float32) + b2)
    assert jnp.allclose(out, y_ref, atol=1e-3, rtol=1e-3), float(jnp.max(jnp.abs(out - y_ref)))

    # Loose sanity check against pure-f32 math (tolerance accounts for bf16 operand rounding).
    y32 = _selu(_selu(x @ w1 + b1) @ w2 + b2)
    assert jnp.allclose(out, y32, atol=5e-2, rtol=5e-2)

    print("KERNEL_OK")
</pallas_src>

<mosaic_0001>
module attributes {stable_mosaic.version = 11 : i64} {
  func.func @fc_module_kernel(%arg0: i32, %arg1: memref<16x128xbf16, #tpu.memory_space<vmem>>, %arg2: memref<128x128xbf16, #tpu.memory_space<vmem>>, %arg3: memref<1x128xf32, #tpu.memory_space<vmem>>, %arg4: memref<128x128xbf16, #tpu.memory_space<vmem>>, %arg5: memref<1x128xf32, #tpu.memory_space<vmem>>, %arg6: memref<16x128xf32, #tpu.memory_space<vmem>>) attributes {dimension_semantics = [#tpu.dimension_semantics<parallel>], iteration_bounds = array<i64: 1>, scalar_prefetch = 0 : i64, scratch_operands = 0 : i64, tpu.core_type = #tpu.core_type<tc>, window_params = [{transform_indices = @transform_0, window_bounds = array<i64: 16, 128>}, {pipeline_mode = #tpu.pipeline_mode<synchronous>, transform_indices = @transform_1, window_bounds = array<i64: 128, 128>}, {pipeline_mode = #tpu.pipeline_mode<synchronous>, transform_indices = @transform_2, window_bounds = array<i64: 1, 128>}, {pipeline_mode = #tpu.pipeline_mode<synchronous>, transform_indices = @transform_3, window_bounds = array<i64: 128, 128>}, {pipeline_mode = #tpu.pipeline_mode<synchronous>, transform_indices = @transform_4, window_bounds = array<i64: 1, 128>}, {transform_indices = @transform_5, window_bounds = array<i64: 16, 128>}]} {
    %c0 = arith.constant 0 : index
    %c0_0 = arith.constant 0 : index
    %0 = vector.load %arg1[%c0, %c0_0] : memref<16x128xbf16, #tpu.memory_space<vmem>>, vector<16x128xbf16>
    %c0_1 = arith.constant 0 : index
    %c0_2 = arith.constant 0 : index
    %1 = vector.load %arg2[%c0_1, %c0_2] : memref<128x128xbf16, #tpu.memory_space<vmem>>, vector<128x128xbf16>
    %cst = arith.constant dense<0.000000e+00> : vector<16x128xf32>
    %2 = tpu.matmul %0, %1, %cst {dimension_numbers = #tpu.dot_dimension_numbers<[1], [0], [0], [1], [0, 0, 1, 1], [], []>} : vector<16x128xbf16>, vector<128x128xbf16>, vector<16x128xf32> -> vector<16x128xf32>
    %c0_3 = arith.constant 0 : index
    %c0_4 = arith.constant 0 : index
    %3 = vector.load %arg3[%c0_3, %c0_4] : memref<1x128xf32, #tpu.memory_space<vmem>>, vector<1x128xf32>
    %4 = vector.broadcast %3 : vector<1x128xf32> to vector<16x128xf32>
    %5 = arith.addf %2, %4 : vector<16x128xf32>
    %cst_5 = arith.constant 0.000000e+00 : f32
    %6 = vector.broadcast %cst_5 : f32 to vector<16x128xf32>
    %7 = arith.cmpf ogt, %5, %6 : vector<16x128xf32>
    %cst_6 = arith.constant 1.05070102 : f32
    %8 = vector.broadcast %cst_6 : f32 to vector<16x128xf32>
    %9 = arith.mulf %8, %5 : vector<16x128xf32>
    %10 = math.exp %5 : vector<16x128xf32>
    %cst_7 = arith.constant 1.75809932 : f32
    %11 = vector.broadcast %cst_7 : f32 to vector<16x128xf32>
    %12 = arith.mulf %11, %10 : vector<16x128xf32>
    %cst_8 = arith.constant 1.75809932 : f32
    %13 = vector.broadcast %cst_8 : f32 to vector<16x128xf32>
    %14 = arith.subf %12, %13 : vector<16x128xf32>
    %15 = arith.select %7, %9, %14 : vector<16x128xi1>, vector<16x128xf32>
    %16 = arith.truncf %15 : vector<16x128xf32> to vector<16x128xbf16>
    %c0_9 = arith.constant 0 : index
    %c0_10 = arith.constant 0 : index
    %17 = vector.load %arg4[%c0_9, %c0_10] : memref<128x128xbf16, #tpu.memory_space<vmem>>, vector<128x128xbf16>
    %cst_11 = arith.constant dense<0.000000e+00> : vector<16x128xf32>
    %18 = tpu.matmul %16, %17, %cst_11 {dimension_numbers = #tpu.dot_dimension_numbers<[1], [0], [0], [1], [0, 0, 1, 1], [], []>} : vector<16x128xbf16>, vector<128x128xbf16>, vector<16x128xf32> -> vector<16x128xf32>
    %c0_12 = arith.constant 0 : index
    %c0_13 = arith.constant 0 : index
    %19 = vector.load %arg5[%c0_12, %c0_13] : memref<1x128xf32, #tpu.memory_space<vmem>>, vector<1x128xf32>
    %20 = vector.broadcast %19 : vector<1x128xf32> to vector<16x128xf32>
    %21 = arith.addf %18, %20 : vector<16x128xf32>
    %cst_14 = arith.constant 0.000000e+00 : f32
    %22 = vector.broadcast %cst_14 : f32 to vector<16x128xf32>
    %23 = arith.cmpf ogt, %21, %22 : vector<16x128xf32>
    %cst_15 = arith.constant 1.05070102 : f32
    %24 = vector.broadcast %cst_15 : f32 to vector<16x128xf32>
    %25 = arith.mulf %24, %21 : vector<16x128xf32>
    %26 = math.exp %21 : vector<16x128xf32>
    %cst_16 = arith.constant 1.75809932 : f32
    %27 = vector.broadcast %cst_16 : f32 to vector<16x128xf32>
    %28 = arith.mulf %27, %26 : vector<16x128xf32>
    %cst_17 = arith.constant 1.75809932 : f32
    %29 = vector.broadcast %cst_17 : f32 to vector<16x128xf32>
    %30 = arith.subf %28, %29 : vector<16x128xf32>
    %31 = arith.select %23, %25, %30 : vector<16x128xi1>, vector<16x128xf32>
    %c0_18 = arith.constant 0 : index
    %c0_19 = arith.constant 0 : index
    %32 = vector.load %arg6[%c0_18, %c0_19] : memref<16x128xf32, #tpu.memory_space<vmem>>, vector<16x128xf32>
    tpu.vector_store %arg6[%c0_18, %c0_19], %31 {strides = array<i32>} : memref<16x128xf32, #tpu.memory_space<vmem>>, vector<16x128xf32>,
    return
  }
  func.func @transform_0(%arg0: i32) -> (i32, i32) {
    %c0_i32 = arith.constant 0 : i32
    %c0_i32_0 = arith.constant 0 : i32
    return %arg0, %c0_i32 : i32, i32
  }
  func.func @transform_1(%arg0: i32) -> (i32, i32) {
    %c0_i32 = arith.constant 0 : i32
    %c0_i32_0 = arith.constant 0 : i32
    %c0_i32_1 = arith.constant 0 : i32
    return %c0_i32, %c0_i32_0 : i32, i32
  }
  func.func @transform_2(%arg0: i32) -> (i32, i32) {
    %c0_i32 = arith.constant 0 : i32
    %c0_i32_0 = arith.constant 0 : i32
    %c0_i32_1 = arith.constant 0 : i32
    return %c0_i32, %c0_i32_0 : i32, i32
  }
  func.func @transform_3(%arg0: i32) -> (i32, i32) {
    %c0_i32 = arith.constant 0 : i32
    %c0_i32_0 = arith.constant 0 : i32
    %c0_i32_1 = arith.constant 0 : i32
    return %c0_i32, %c0_i32_0 : i32, i32
  }
  func.func @transform_4(%arg0: i32) -> (i32, i32) {
    %c0_i32 = arith.constant 0 : i32
    %c0_i32_0 = arith.constant 0 : i32
    %c0_i32_1 = arith.constant 0 : i32
    return %c0_i32, %c0_i32_0 : i32, i32
  }
  func.func @transform_5(%arg0: i32) -> (i32, i32) {
    %c0_i32 = arith.constant 0 : i32
    %c0_i32_0 = arith.constant 0 : i32
    return %arg0, %c0_i32 : i32, i32
  }
}

module attributes {stable_mosaic.version = 11 : i64} {
  func.func @fc_module_kernel(%arg0: i32, %arg1: memref<16x128xbf16, #tpu.memory_space<vmem>>, %arg2: memref<128x128xbf16, #tpu.memory_space<vmem>>, %arg3: memref<1x128xf32, #tpu.memory_space<vmem>>, %arg4: memref<128x128xbf16, #tpu.memory_space<vmem>>, %arg5: memref<1x128xf32, #tpu.memory_space<vmem>>, %arg6: memref<16x128xf32, #tpu.memory_space<vmem>>) attributes {dimension_semantics = [#tpu.dimension_semantics<parallel>], iteration_bounds = array<i64: 1>, scalar_prefetch = 0 : i64, scratch_operands = 0 : i64, tpu.core_type = #tpu.core_type<tc>, window_params = [{transform_indices = @transform_0, window_bounds = array<i64: 16, 128>}, {pipeline_mode = #tpu.pipeline_mode<synchronous>, transform_indices = @transform_1, window_bounds = array<i64: 128, 128>}, {pipeline_mode = #tpu.pipeline_mode<synchronous>, transform_indices = @transform_2, window_bounds = array<i64: 1, 128>}, {pipeline_mode = #tpu.pipeline_mode<synchronous>, transform_indices = @transform_3, window_bounds = array<i64: 128, 128>}, {pipeline_mode = #tpu.pipeline_mode<synchronous>, transform_indices = @transform_4, window_bounds = array<i64: 1, 128>}, {transform_indices = @transform_5, window_bounds = array<i64: 16, 128>}]} {
    %c0 = arith.constant 0 : index
    %c0_0 = arith.constant 0 : index
    %0 = vector.load %arg1[%c0, %c0_0] : memref<16x128xbf16, #tpu.memory_space<vmem>>, vector<16x128xbf16>
    %c0_1 = arith.constant 0 : index
    %c0_2 = arith.constant 0 : index
    %1 = vector.load %arg2[%c0_1, %c0_2] : memref<128x128xbf16, #tpu.memory_space<vmem>>, vector<128x128xbf16>
    %cst = arith.constant dense<0.000000e+00> : vector<16x128xf32>
    %2 = tpu.matmul %0, %1, %cst {dimension_numbers = #tpu.dot_dimension_numbers<[1], [0], [0], [1], [0, 0, 1, 1], [], []>} : vector<16x128xbf16>, vector<128x128xbf16>, vector<16x128xf32> -> vector<16x128xf32>
    %c0_3 = arith.constant 0 : index
    %c0_4 = arith.constant 0 : index
    %3 = vector.load %arg3[%c0_3, %c0_4] : memref<1x128xf32, #tpu.memory_space<vmem>>, vector<1x128xf32>
    %4 = vector.broadcast %3 : vector<1x128xf32> to vector<16x128xf32>
    %5 = arith.addf %2, %4 : vector<16x128xf32>
    %cst_5 = arith.constant 0.000000e+00 : f32
    %6 = vector.broadcast %cst_5 : f32 to vector<16x128xf32>
    %7 = arith.cmpf ogt, %5, %6 : vector<16x128xf32>
    %cst_6 = arith.constant 1.05070102 : f32
    %8 = vector.broadcast %cst_6 : f32 to vector<16x128xf32>
    %9 = arith.mulf %8, %5 : vector<16x128xf32>
    %10 = math.exp %5 : vector<16x128xf32>
    %cst_7 = arith.constant 1.75809932 : f32
    %11 = vector.broadcast %cst_7 : f32 to vector<16x128xf32>
    %12 = arith.mulf %11, %10 : vector<16x128xf32>
    %cst_8 = arith.constant 1.75809932 : f32
    %13 = vector.broadcast %cst_8 : f32 to vector<16x128xf32>
    %14 = arith.subf %12, %13 : vector<16x128xf32>
    %15 = arith.select %7, %9, %14 : vector<16x128xi1>, vector<16x128xf32>
    %16 = arith.truncf %15 : vector<16x128xf32> to vector<16x128xbf16>
    %c0_9 = arith.constant 0 : index
    %c0_10 = arith.constant 0 : index
    %17 = vector.load %arg4[%c0_9, %c0_10] : memref<128x128xbf16, #tpu.memory_space<vmem>>, vector<128x128xbf16>
    %cst_11 = arith.constant dense<0.000000e+00> : vector<16x128xf32>
    %18 = tpu.matmul %16, %17, %cst_11 {dimension_numbers = #tpu.dot_dimension_numbers<[1], [0], [0], [1], [0, 0, 1, 1], [], []>} : vector<16x128xbf16>, vector<128x128xbf16>, vector<16x128xf32> -> vector<16x128xf32>
    %c0_12 = arith.constant 0 : index
    %c0_13 = arith.constant 0 : index
    %19 = vector.load %arg5[%c0_12, %c0_13] : memref<1x128xf32, #tpu.memory_space<vmem>>, vector<1x128xf32>
    %20 = vector.broadcast %19 : vector<1x128xf32> to vector<16x128xf32>
    %21 = arith.addf %18, %20 : vector<16x128xf32>
    %cst_14 = arith.constant 0.000000e+00 : f32
    %22 = vector.broadcast %cst_14 : f32 to vector<16x128xf32>
    %23 = arith.cmpf ogt, %21, %22 : vector<16x128xf32>
    %cst_15 = arith.constant 1.05070102 : f32
    %24 = vector.broadcast %cst_15 : f32 to vector<16x128xf32>
    %25 = arith.mulf %24, %21 : vector<16x128xf32>
    %26 = math.exp %21 : vector<16x128xf32>
    %cst_16 = arith.constant 1.75809932 : f32
    %27 = vector.broadcast %cst_16 : f32 to vector<16x128xf32>
    %28 = arith.mulf %27, %26 : vector<16x128xf32>
    %cst_17 = arith.constant 1.75809932 : f32
    %29 = vector.broadcast %cst_17 : f32 to vector<16x128xf32>
    %30 = arith.subf %28, %29 : vector<16x128xf32>
    %31 = arith.select %23, %25, %30 : vector<16x128xi1>, vector<16x128xf32>
    %c0_18 = arith.constant 0 : index
    %c0_19 = arith.constant 0 : index
    %32 = vector.load %arg6[%c0_18, %c0_19] : memref<16x128xf32, #tpu.memory_space<vmem>>, vector<16x128xf32>
    tpu.vector_store %arg6[%c0_18, %c0_19], %31 {strides = array<i32>} : memref<16x128xf32, #tpu.memory_space<vmem>>, vector<16x128xf32>,
    return
  }
  func.func @transform_0(%arg0: i32) -> (i32, i32) {
    %c0_i32 = arith.constant 0 : i32
    %c0_i32_0 = arith.constant 0 : i32
    return %arg0, %c0_i32 : i32, i32
  }
  func.func @transform_1(%arg0: i32) -> (i32, i32) {
    %c0_i32 = arith.constant 0 : i32
    %c0_i32_0 = arith.constant 0 : i32
    %c0_i32_1 = arith.constant 0 : i32
    return %c0_i32, %c0_i32_0 : i32, i32
  }
  func.func @transform_2(%arg0: i32) -> (i32, i32) {
    %c0_i32 = arith.constant 0 : i32
    %c0_i32_0 = arith.constant 0 : i32
    %c0_i32_1 = arith.constant 0 : i32
    return %c0_i32, %c0_i32_0 : i32, i32
  }
  func.func @transform_3(%arg0: i32) -> (i32, i32) {
    %c0_i32 = arith.constant 0 : i32
    %c0_i32_0 = arith.constant 0 : i32
    %c0_i32_1 = arith.constant 0 : i32
    return %c0_i32, %c0_i32_0 : i32, i32
  }
  func.func @transform_4(%arg0: i32) -> (i32, i32) {
    %c0_i32 = arith.constant 0 : i32
    %c0_i32_0 = arith.constant 0 : i32
    %c0_i32_1 = arith.constant 0 : i32
    return %c0_i32, %c0_i32_0 : i32, i32
  }
  func.func @transform_5(%arg0: i32) -> (i32, i32) {
    %c0_i32 = arith.constant 0 : i32
    %c0_i32_0 = arith.constant 0 : i32
    return %arg0, %c0_i32 : i32, i32
  }
}

</mosaic_0001>

<bundles_post_ra>
// kernel: tpu_custom_call.1
= control target key start
LH: loop header
LB: loop body
LE: loop exit
PB: predicated region body
PF: predicated region fallthrough
CT: control target
= control target key end

     0   :  { %10 = vsyncpa [#allocation3], 0  ;;  %s604_s0 = inlined_call_operand.hbm [shape: bf16[16,128], index: 0, kind: input, shape index: {}]   ;;  %s605_s1 = inlined_call_operand.hbm [shape: bf16[128,128], index: 1, kind: input, shape index: {}]   ;;  %s606_s2 = inlined_call_operand.vmem [shape: f32[1,128], index: 2, kind: input, shape index: {}]   ;;  %s607_s3 = inlined_call_operand.hbm [shape: bf16[128,128], index: 3, kind: input, shape index: {}]   ;;  %s608_s4 = inlined_call_operand.vmem [shape: f32[1,128], index: 4, kind: input, shape index: {}]   ;;  %s609_s5 = inlined_call_operand.hbm [shape: f32[16,128], index: 5, kind: output, shape index: {}]  }
   0x1   :  { %11 = vsyncpa [#allocation6], 0 }
   0x2   :  { %12 = vsyncpa [#allocation4], 0  ;;  %s546_s18 = smov [#allocation5]   ;;  %s547_s20 = smov [#allocation2]  }
   0x3   :  { %s30_s19 = sshll.u32 %s546_s18, 4  ;;  %s18_s21 = sshll.u32 %s547_s20, 4  ;;  %s31_s19 = int_to_ptr.vmem [resolvable:$true] %s30_s19  ;;  %s19_s21 = int_to_ptr.vmem [resolvable:$true] %s18_s21 }
   0x4   :  { %s468_s22 = scalar_lea.vmem %s31_s19, 1024  ;;  %p473_p1 = scmp.lt.s32.totalorder %s31_s19, %s31_s19 }
   0x5   :  { %p469_p0 = scmp.ne.s32.totalorder %s31_s19, %s468_s22  ;;  %p474_p2 = scmp.lt.s32.totalorder %s468_s22, %s468_s22 }
   0x7   :  { %p475_p3 = por %p474_p2, %p473_p1 }
   0x9   :  { %p476_p4 = pnand %p475_p3, %p469_p0 }
   0xb   :  { %479 = shalt.err (!%p476_p4)
}
   0xc   :  { %s548_s23 = smov 64   ;;  %s549_s24 = smov 4  }
   0xd   :  { %36 = dma.hbm_to_vmem [thread:$0]  %s605_s1, 1024, %s31_s19, [#allocation6], %s548_s23, %s548_s23, %s549_s24  }
   0xe   :  { %s488_s27 = scalar_lea.vmem %s19_s21, 128  ;;  %p493_p6 = scmp.lt.s32.totalorder %s19_s21, %s19_s21 }
   0xf   :  { %p489_p5 = scmp.ne.s32.totalorder %s19_s21, %s488_s27  ;;  %p494_p7 = scmp.lt.s32.totalorder %s488_s27, %s488_s27 }
  0x11   :  { %p495_p8 = por %p494_p7, %p493_p6 }
  0x13   :  { %p496_p9 = pnand %p495_p8, %p489_p5 }
  0x15   :  { %499 = shalt.err (!%p496_p9)
}
  0x16   :  { %24 = dma.hbm_to_vmem [thread:$0]  %s604_s0, 128, %s19_s21, [#allocation3], %s548_s23, %s548_s23, %s549_s24  }
  0x17   :  { %s550_s30 = smov [#allocation7]  }
  0x18   :  { %s44_s6 = sshll.u32 %s550_s30, 4  ;;  %s45_s6 = int_to_ptr.vmem [resolvable:$true] %s44_s6 }
  0x19   :  { %s508_s7 = scalar_lea.vmem %s45_s6, 1024  ;;  %p513_p11 = scmp.lt.s32.totalorder %s45_s6, %s45_s6 }
  0x1a   :  { %p509_p10 = scmp.ne.s32.totalorder %s45_s6, %s508_s7  ;;  %p514_p12 = scmp.lt.s32.totalorder %s508_s7, %s508_s7 }
  0x1c   :  { %p515_p13 = por %p514_p12, %p513_p11 }
  0x1e   :  { %p516_p0 = pnand %p515_p13, %p509_p10 }
  0x20   :  { %519 = shalt.err (!%p516_p0)
}
  0x21   :  { %50 = dma.hbm_to_vmem [thread:$0]  %s607_s3, 1024, %s45_s6, [#allocation6], %s548_s23, %s548_s23, %s549_s24  }
  0x22   :  { %540 = dma.done.wait [#allocation3], 128  }
  0x23   :  { %541 = vsyncadd [#allocation3], 4294967168 }
  0x24   :  { %542 = dma.done.wait [#allocation6], 2048  }
  0x25   :  { %543 = vsyncadd [#allocation6], 4294965248  ;;  %v551_v0 = vmov 0.0   ;;  %vm552_vm0 = vmmov 0   ;;  %v435_v1 = vld [vmem:[#allocation5 + $0x38] sm:$0xff]   ;;  %v436_v2 = vld [vmem:[#allocation5 + $0x30] sm:$0xff]  }
  0x26   :  { %385 = vmatprep.subr.bf16.mxu0 %v551_v0  ;;  %401 = vmatprep.mubr.msk.bf16.mxu0 %vm552_vm0, %v551_v0  ;;  %v437_v3 = vld [vmem:[#allocation5 + $0x28] sm:$0xff]   ;;  %v444_v4 = vld [vmem:[#allocation7 + $0x38] sm:$0xff]   ;;  %v438_v5 = vld [vmem:[#allocation5 + $0x20] sm:$0xff]   ;;  %s553_s10 = smov [#allocation8]  }
  0x27   :  { %405 = vmatprep.subr.bf16.mxu1 %v551_v0  ;;  %421 = vmatprep.mubr.msk.bf16.mxu1 %vm552_vm0, %v551_v0  ;;  %v439_v6 = vld [vmem:[#allocation5 + $0x18] sm:$0xff]   ;;  %v440_v7 = vld [vmem:[#allocation5 + $0x10] sm:$0xff]   ;;  %v441_v8 = vld [vmem:[#allocation5 + $0x8] sm:$0xff]   ;;  %s331_s11 = sshll.u32 %s553_s10, 4  ;;  %s332_s11 = int_to_ptr.vmem [resolvable:$true] %s331_s11 }
  0x28   :  { %386 = vmatpush3.bf16.msra.mxu0 %v435_v1  ;;  %406 = vmatpush3.bf16.msra.mxu1 %v444_v4  ;;  %v442_v9 = vld [vmem:[#allocation5] sm:$0xff]   ;;  %v443_v10 = vld [vmem:[#allocation2] sm:$0xff]   ;;  %v445_v11 = vld [vmem:[#allocation7 + $0x30] sm:$0xff]   ;;  %p525_p2 = scmp.lt.s32.totalorder %s332_s11, %s332_s11 }
  0x29   :  { %387 = vmatprep.subr.bf16.mxu0 %v551_v0  ;;  %407 = vmatprep.subr.bf16.mxu1 %v551_v0  ;;  %v446_v12 = vld [vmem:[#allocation7 + $0x28] sm:$0xff]   ;;  %v447_v13 = vld [vmem:[#allocation7 + $0x20] sm:$0xff]   ;;  %v448_v14 = vld [vmem:[#allocation7 + $0x18] sm:$0xff]  }
  0x2a   :  { %v449_v15 = vld [vmem:[#allocation7 + $0x10] sm:$0xff]   ;;  %v450_v16 = vld [vmem:[#allocation7 + $0x8] sm:$0xff]   ;;  %v451_v17 = vld [vmem:[#allocation7] sm:$0xff]  }
  0x2b   :  { %v344_v18 = vld [vmem:[%s606_s2] ss:$0 sm:$0xff] }
  0x2c   :  { %388 = vmatpush3.bf16.msra.mxu0 %v436_v2  ;;  %408 = vmatpush3.bf16.msra.mxu1 %v445_v11  ;;  %v356_v38 = vld [vmem:[%s608_s4] ss:$0 sm:$0xff]  ;;  %s520_s4 = scalar_lea.vmem %s332_s11, 256 }
  0x2d   :  { %389 = vmatprep.subr.bf16.mxu0 %v551_v0  ;;  %409 = vmatprep.subr.bf16.mxu1 %v551_v0  ;;  %p521_p1 = scmp.ne.s32.totalorder %s332_s11, %s520_s4  ;;  %p526_p3 = scmp.lt.s32.totalorder %s520_s4, %s520_s4 }
  0x2f   :  { %p527_p4 = por %p526_p3, %p525_p2 }
  0x30   :  { %390 = vmatpush3.bf16.msra.mxu0 %v437_v3  ;;  %410 = vmatpush3.bf16.msra.mxu1 %v446_v12 }
  0x31   :  { %391 = vmatprep.subr.bf16.mxu0 %v551_v0  ;;  %411 = vmatprep.subr.bf16.mxu1 %v551_v0  ;;  %p528_p5 = pnand %p527_p4, %p521_p1 }
  0x34   :  { %392 = vmatpush3.bf16.msra.mxu0 %v438_v5  ;;  %412 = vmatpush3.bf16.msra.mxu1 %v447_v13 }
  0x35   :  { %393 = vmatprep.subr.bf16.mxu0 %v551_v0  ;;  %413 = vmatprep.subr.bf16.mxu1 %v551_v0 }
  0x38   :  { %394 = vmatpush3.bf16.msra.mxu0 %v439_v6  ;;  %414 = vmatpush3.bf16.msra.mxu1 %v448_v14 }
  0x39   :  { %395 = vmatprep.subr.bf16.mxu0 %v551_v0  ;;  %415 = vmatprep.subr.bf16.mxu1 %v551_v0 }
  0x3c   :  { %396 = vmatpush3.bf16.msra.mxu0 %v440_v7  ;;  %416 = vmatpush3.bf16.msra.mxu1 %v449_v15 }
  0x3d   :  { %397 = vmatprep.subr.bf16.mxu0 %v551_v0  ;;  %417 = vmatprep.subr.bf16.mxu1 %v551_v0 }
  0x40   :  { %398 = vmatpush3.bf16.msra.mxu0 %v441_v8  ;;  %418 = vmatpush3.bf16.msra.mxu1 %v450_v16 }
  0x41   :  { %399 = vmatprep.subr.bf16.mxu0 %v551_v0  ;;  %419 = vmatprep.subr.bf16.mxu1 %v551_v0 }
  0x44   :  { %400 = vmatpush3.bf16.msra.mxu0 %v442_v9  ;;  %420 = vmatpush3.bf16.msra.mxu1 %v451_v17 }
  0x47   :  { %402 = vmatmul.mubr.bf16.vlgmr.msra.gmra.mxu0 %v443_v10 }
 0x107   :  { %v176_v19 = vpop.f32.mrf.mxu0 }
 0x108   :  { %v177_v20 = vadd.f32 %v344_v18, %v176_v19 }
 0x109   :  { %v403_v21 = vpop.f32.mrf.mxu0 }
 0x10a   :  { %v187_v22 = vmul.f32 1.442695, %v177_v20  ;;  %v185_v32 = vmul.f32 1.050701, %v177_v20  ;;  %vm183_vm1 = vcmp.gt.f32.partialorder %v177_v20, 0.0 }
 0x10b   :  { %v179_v23 = vpop.f32.mrf.mxu0 }
 0x10c   :  { %452 = vpow2.f32 %v187_v22  ;;  %v180_v24 = vadd.f32 %v344_v18, %v179_v23 }
 0x10d   :  { %v404_v25 = vpop.f32.mrf.mxu0 }
 0x10e   :  { %v189_v26 = vmul.f32 1.442695, %v180_v24  ;;  %v186_v33 = vmul.f32 1.050701, %v180_v24  ;;  %vm184_vm2 = vcmp.gt.f32.partialorder %v180_v24, 0.0 }
 0x110   :  { %454 = vpow2.f32 %v189_v26 }
 0x119   :  { %v453_v27 = vpop.eup %452 }
 0x11a   :  { %v191_v28 = vmul.f32 1.7580993, %v453_v27 }
 0x11c   :  { %v354_v31 = vadd.f32 -1.7580993, %v191_v28 }
 0x11d   :  { %v455_v29 = vpop.eup %454 }
 0x11e   :  { %v192_v30 = vmul.f32 1.7580993, %v455_v29  ;;  %v195_v35 = vsel %vm183_vm1, %v185_v32, %v354_v31 }
 0x120   :  { %v355_v34 = vadd.f32 -1.7580993, %v192_v30 }
 0x122   :  { %v196_v36 = vsel %vm184_vm2, %v186_v33, %v355_v34 }
 0x123   :  { %v197_v37 = vpack.c.bf16 %v196_v36, %v195_v35 }
 0x125   :  { %422 = vmatmul.mubr.bf16.vlgmr.msra.gmra.mxu1 %v197_v37 }
 0x1e5   :  { %v303_v39 = vpop.f32.mrf.mxu1 }
 0x1e6   :  { %v304_v40 = vadd.f32 %v356_v38, %v303_v39 }
 0x1e7   :  { %v423_v41 = vpop.f32.mrf.mxu1 }
 0x1e8   :  { %v314_v42 = vmul.f32 1.442695, %v304_v40  ;;  %v312_v49 = vmul.f32 1.050701, %v304_v40  ;;  %vm310_vm3 = vcmp.gt.f32.partialorder %v304_v40, 0.0 }
 0x1e9   :  { %v306_v43 = vpop.f32.mrf.mxu1 }
 0x1ea   :  { %456 = vpow2.f32 %v314_v42  ;;  %v307_v44 = vadd.f32 %v356_v38, %v306_v43 }
 0x1eb   :  { %v424_v45 = vpop.f32.mrf.mxu1 }
 0x1ec   :  { %v316_v46 = vmul.f32 1.442695, %v307_v44  ;;  %v313_v54 = vmul.f32 1.050701, %v307_v44  ;;  %vm311_vm4 = vcmp.gt.f32.partialorder %v307_v44, 0.0 }
 0x1ee   :  { %458 = vpow2.f32 %v316_v46 }
 0x1f7   :  { %v457_v47 = vpop.eup %456 }
 0x1f8   :  { %v318_v48 = vmul.f32 1.7580993, %v457_v47 }
 0x1fa   :  { %v365_v50 = vadd.f32 -1.7580993, %v318_v48 }
 0x1fb   :  { %v459_v51 = vpop.eup %458 }
 0x1fc   :  { %v322_v52 = vsel %vm310_vm3, %v312_v49, %v365_v50  ;;  %v319_v53 = vmul.f32 1.7580993, %v459_v51 }
 0x1fd   :  { %324 = vst [vmem:[#allocation8] sm:$0xff] %v322_v52 }
 0x1fe   :  { %v366_v55 = vadd.f32 -1.7580993, %v319_v53 }
 0x200   :  { %v323_v56 = vsel %vm311_vm4, %v313_v54, %v366_v55 }
 0x201   :  { %325 = vst [vmem:[#allocation8 + $0x8] sm:$0xff] %v323_v56 }
 0x202   :  { %531 = shalt.err (!%p528_p5)
}
 0x203   :  { %s554_s12 = smov 128   ;;  %s555_s13 = smov 8  }
 0x204   :  { %337 = dma.vmem_to_hbm [thread:$0]  %s332_s11, 256, %s609_s5, [#allocation4], %s554_s12, %s554_s12, %s555_s13  }
 0x205   :  { %544 = dma.done.wait [#allocation4], 256  }
 0x206   :  { %545 = vsyncadd [#allocation4], 4294967040 }
 0x207   :  { %341 = vsyncpa [#allocation3], 1 }
 0x208   :  { %342 = vsyncpa [#allocation6], 1 }
 0x209   :  { %343 = vsyncpa [#allocation4], 1 }

// kernel: tpu_custom_call.1
= control target key start
LH: loop header
LB: loop body
LE: loop exit
PB: predicated region body
PF: predicated region fallthrough
CT: control target
= control target key end

     0   :  { %10 = vsyncpa [#allocation3], 0  ;;  %s604_s0 = inlined_call_operand.hbm [shape: bf16[16,128], index: 0, kind: input, shape index: {}]   ;;  %s605_s1 = inlined_call_operand.hbm [shape: bf16[128,128], index: 1, kind: input, shape index: {}]   ;;  %s606_s2 = inlined_call_operand.vmem [shape: f32[1,128], index: 2, kind: input, shape index: {}]   ;;  %s607_s3 = inlined_call_operand.hbm [shape: bf16[128,128], index: 3, kind: input, shape index: {}]   ;;  %s608_s4 = inlined_call_operand.vmem [shape: f32[1,128], index: 4, kind: input, shape index: {}]   ;;  %s609_s5 = inlined_call_operand.hbm [shape: f32[16,128], index: 5, kind: output, shape index: {}]  }
   0x1   :  { %11 = vsyncpa [#allocation6], 0 }
   0x2   :  { %12 = vsyncpa [#allocation4], 0  ;;  %s546_s18 = smov [#allocation5]   ;;  %s547_s20 = smov [#allocation2]  }
   0x3   :  { %s30_s19 = sshll.u32 %s546_s18, 4  ;;  %s18_s21 = sshll.u32 %s547_s20, 4  ;;  %s31_s19 = int_to_ptr.vmem [resolvable:$true] %s30_s19  ;;  %s19_s21 = int_to_ptr.vmem [resolvable:$true] %s18_s21 }
   0x4   :  { %s468_s22 = scalar_lea.vmem %s31_s19, 1024  ;;  %p473_p1 = scmp.lt.s32.totalorder %s31_s19, %s31_s19 }
   0x5   :  { %p469_p0 = scmp.ne.s32.totalorder %s31_s19, %s468_s22  ;;  %p474_p2 = scmp.lt.s32.totalorder %s468_s22, %s468_s22 }
   0x7   :  { %p475_p3 = por %p474_p2, %p473_p1 }
   0x9   :  { %p476_p4 = pnand %p475_p3, %p469_p0 }
   0xb   :  { %479 = shalt.err (!%p476_p4)
}
   0xc   :  { %s548_s23 = smov 64   ;;  %s549_s24 = smov 4  }
   0xd   :  { %36 = dma.hbm_to_vmem [thread:$0]  %s605_s1, 1024, %s31_s19, [#allocation6], %s548_s23, %s548_s23, %s549_s24  }
   0xe   :  { %s488_s27 = scalar_lea.vmem %s19_s21, 128  ;;  %p493_p6 = scmp.lt.s32.totalorder %s19_s21, %s19_s21 }
   0xf   :  { %p489_p5 = scmp.ne.s32.totalorder %s19_s21, %s488_s27  ;;  %p494_p7 = scmp.lt.s32.totalorder %s488_s27, %s488_s27 }
  0x11   :  { %p495_p8 = por %p494_p7, %p493_p6 }
  0x13   :  { %p496_p9 = pnand %p495_p8, %p489_p5 }
  0x15   :  { %499 = shalt.err (!%p496_p9)
}
  0x16   :  { %24 = dma.hbm_to_vmem [thread:$0]  %s604_s0, 128, %s19_s21, [#allocation3], %s548_s23, %s548_s23, %s549_s24  }
  0x17   :  { %s550_s30 = smov [#allocation7]  }
  0x18   :  { %s44_s6 = sshll.u32 %s550_s30, 4  ;;  %s45_s6 = int_to_ptr.vmem [resolvable:$true] %s44_s6 }
  0x19   :  { %s508_s7 = scalar_lea.vmem %s45_s6, 1024  ;;  %p513_p11 = scmp.lt.s32.totalorder %s45_s6, %s45_s6 }
  0x1a   :  { %p509_p10 = scmp.ne.s32.totalorder %s45_s6, %s508_s7  ;;  %p514_p12 = scmp.lt.s32.totalorder %s508_s7, %s508_s7 }
  0x1c   :  { %p515_p13 = por %p514_p12, %p513_p11 }
  0x1e   :  { %p516_p0 = pnand %p515_p13, %p509_p10 }
  0x20   :  { %519 = shalt.err (!%p516_p0)
}
  0x21   :  { %50 = dma.hbm_to_vmem [thread:$0]  %s607_s3, 1024, %s45_s6, [#allocation6], %s548_s23, %s548_s23, %s549_s24  }
  0x22   :  { %540 = dma.done.wait [#allocation3], 128  }
  0x23   :  { %541 = vsyncadd [#allocation3], 4294967168 }
  0x24   :  { %542 = dma.done.wait [#allocation6], 2048  }
  0x25   :  { %543 = vsyncadd [#allocation6], 4294965248  ;;  %v551_v0 = vmov 0.0   ;;  %vm552_vm0 = vmmov 0   ;;  %v435_v1 = vld [vmem:[#allocation5 + $0x38] sm:$0xff]   ;;  %v436_v2 = vld [vmem:[#allocation5 + $0x30] sm:$0xff]  }
  0x26   :  { %385 = vmatprep.subr.bf16.mxu0 %v551_v0  ;;  %401 = vmatprep.mubr.msk.bf16.mxu0 %vm552_vm0, %v551_v0  ;;  %v437_v3 = vld [vmem:[#allocation5 + $0x28] sm:$0xff]   ;;  %v444_v4 = vld [vmem:[#allocation7 + $0x38] sm:$0xff]   ;;  %v438_v5 = vld [vmem:[#allocation5 + $0x20] sm:$0xff]   ;;  %s553_s10 = smov [#allocation8]  }
  0x27   :  { %405 = vmatprep.subr.bf16.mxu1 %v551_v0  ;;  %421 = vmatprep.mubr.msk.bf16.mxu1 %vm552_vm0, %v551_v0  ;;  %v439_v6 = vld [vmem:[#allocation5 + $0x18] sm:$0xff]   ;;  %v440_v7 = vld [vmem:[#allocation5 + $0x10] sm:$0xff]   ;;  %v441_v8 = vld [vmem:[#allocation5 + $0x8] sm:$0xff]   ;;  %s331_s11 = sshll.u32 %s553_s10, 4  ;;  %s332_s11 = int_to_ptr.vmem [resolvable:$true] %s331_s11 }
  0x28   :  { %386 = vmatpush3.bf16.msra.mxu0 %v435_v1  ;;  %406 = vmatpush3.bf16.msra.mxu1 %v444_v4  ;;  %v442_v9 = vld [vmem:[#allocation5] sm:$0xff]   ;;  %v443_v10 = vld [vmem:[#allocation2] sm:$0xff]   ;;  %v445_v11 = vld [vmem:[#allocation7 + $0x30] sm:$0xff]   ;;  %p525_p2 = scmp.lt.s32.totalorder %s332_s11, %s332_s11 }
  0x29   :  { %387 = vmatprep.subr.bf16.mxu0 %v551_v0  ;;  %407 = vmatprep.subr.bf16.mxu1 %v551_v0  ;;  %v446_v12 = vld [vmem:[#allocation7 + $0x28] sm:$0xff]   ;;  %v447_v13 = vld [vmem:[#allocation7 + $0x20] sm:$0xff]   ;;  %v448_v14 = vld [vmem:[#allocation7 + $0x18] sm:$0xff]  }
  0x2a   :  { %v449_v15 = vld [vmem:[#allocation7 + $0x10] sm:$0xff]   ;;  %v450_v16 = vld [vmem:[#allocation7 + $0x8] sm:$0xff]   ;;  %v451_v17 = vld [vmem:[#allocation7] sm:$0xff]  }
  0x2b   :  { %v344_v18 = vld [vmem:[%s606_s2] ss:$0 sm:$0xff] }
  0x2c   :  { %388 = vmatpush3.bf16.msra.mxu0 %v436_v2  ;;  %408 = vmatpush3.bf16.msra.mxu1 %v445_v11  ;;  %v356_v38 = vld [vmem:[%s608_s4] ss:$0 sm:$0xff]  ;;  %s520_s4 = scalar_lea.vmem %s332_s11, 256 }
  0x2d   :  { %389 = vmatprep.subr.bf16.mxu0 %v551_v0  ;;  %409 = vmatprep.subr.bf16.mxu1 %v551_v0  ;;  %p521_p1 = scmp.ne.s32.totalorder %s332_s11, %s520_s4  ;;  %p526_p3 = scmp.lt.s32.totalorder %s520_s4, %s520_s4 }
  0x2f   :  { %p527_p4 = por %p526_p3, %p525_p2 }
  0x30   :  { %390 = vmatpush3.bf16.msra.mxu0 %v437_v3  ;;  %410 = vmatpush3.bf16.msra.mxu1 %v446_v12 }
  0x31   :  { %391 = vmatprep.subr.bf16.mxu0 %v551_v0  ;;  %411 = vmatprep.subr.bf16.mxu1 %v551_v0  ;;  %p528_p5 = pnand %p527_p4, %p521_p1 }
  0x34   :  { %392 = vmatpush3.bf16.msra.mxu0 %v438_v5  ;;  %412 = vmatpush3.bf16.msra.mxu1 %v447_v13 }
  0x35   :  { %393 = vmatprep.subr.bf16.mxu0 %v551_v0  ;;  %413 = vmatprep.subr.bf16.mxu1 %v551_v0 }
  0x38   :  { %394 = vmatpush3.bf16.msra.mxu0 %v439_v6  ;;  %414 = vmatpush3.bf16.msra.mxu1 %v448_v14 }
  0x39   :  { %395 = vmatprep.subr.bf16.mxu0 %v551_v0  ;;  %415 = vmatprep.subr.bf16.mxu1 %v551_v0 }
  0x3c   :  { %396 = vmatpush3.bf16.msra.mxu0 %v440_v7  ;;  %416 = vmatpush3.bf16.msra.mxu1 %v449_v15 }
  0x3d   :  { %397 = vmatprep.subr.bf16.mxu0 %v551_v0  ;;  %417 = vmatprep.subr.bf16.mxu1 %v551_v0 }
  0x40   :  { %398 = vmatpush3.bf16.msra.mxu0 %v441_v8  ;;  %418 = vmatpush3.bf16.msra.mxu1 %v450_v16 }
  0x41   :  { %399 = vmatprep.subr.bf16.mxu0 %v551_v0  ;;  %419 = vmatprep.subr.bf16.mxu1 %v551_v0 }
  0x44   :  { %400 = vmatpush3.bf16.msra.mxu0 %v442_v9  ;;  %420 = vmatpush3.bf16.msra.mxu1 %v451_v17 }
  0x47   :  { %402 = vmatmul.mubr.bf16.vlgmr.msra.gmra.mxu0 %v443_v10 }
 0x107   :  { %v176_v19 = vpop.f32.mrf.mxu0 }
 0x108   :  { %v177_v20 = vadd.f32 %v344_v18, %v176_v19 }
 0x109   :  { %v403_v21 = vpop.f32.mrf.mxu0 }
 0x10a   :  { %v187_v22 = vmul.f32 1.442695, %v177_v20  ;;  %v185_v32 = vmul.f32 1.050701, %v177_v20  ;;  %vm183_vm1 = vcmp.gt.f32.partialorder %v177_v20, 0.0 }
 0x10b   :  { %v179_v23 = vpop.f32.mrf.mxu0 }
 0x10c   :  { %452 = vpow2.f32 %v187_v22  ;;  %v180_v24 = vadd.f32 %v344_v18, %v179_v23 }
 0x10d   :  { %v404_v25 = vpop.f32.mrf.mxu0 }
 0x10e   :  { %v189_v26 = vmul.f32 1.442695, %v180_v24  ;;  %v186_v33 = vmul.f32 1.050701, %v180_v24  ;;  %vm184_vm2 = vcmp.gt.f32.partialorder %v180_v24, 0.0 }
 0x110   :  { %454 = vpow2.f32 %v189_v26 }
 0x119   :  { %v453_v27 = vpop.eup %452 }
 0x11a   :  { %v191_v28 = vmul.f32 1.7580993, %v453_v27 }
 0x11c   :  { %v354_v31 = vadd.f32 -1.7580993, %v191_v28 }
 0x11d   :  { %v455_v29 = vpop.eup %454 }
 0x11e   :  { %v192_v30 = vmul.f32 1.7580993, %v455_v29  ;;  %v195_v35 = vsel %vm183_vm1, %v185_v32, %v354_v31 }
 0x120   :  { %v355_v34 = vadd.f32 -1.7580993, %v192_v30 }
 0x122   :  { %v196_v36 = vsel %vm184_vm2, %v186_v33, %v355_v34 }
 0x123   :  { %v197_v37 = vpack.c.bf16 %v196_v36, %v195_v35 }
 0x125   :  { %422 = vmatmul.mubr.bf16.vlgmr.msra.gmra.mxu1 %v197_v37 }
 0x1e5   :  { %v303_v39 = vpop.f32.mrf.mxu1 }
 0x1e6   :  { %v304_v40 = vadd.f32 %v356_v38, %v303_v39 }
 0x1e7   :  { %v423_v41 = vpop.f32.mrf.mxu1 }
 0x1e8   :  { %v314_v42 = vmul.f32 1.442695, %v304_v40  ;;  %v312_v49 = vmul.f32 1.050701, %v304_v40  ;;  %vm310_vm3 = vcmp.gt.f32.partialorder %v304_v40, 0.0 }
 0x1e9   :  { %v306_v43 = vpop.f32.mrf.mxu1 }
 0x1ea   :  { %456 = vpow2.f32 %v314_v42  ;;  %v307_v44 = vadd.f32 %v356_v38, %v306_v43 }
 0x1eb   :  { %v424_v45 = vpop.f32.mrf.mxu1 }
 0x1ec   :  { %v316_v46 = vmul.f32 1.442695, %v307_v44  ;;  %v313_v54 = vmul.f32 1.050701, %v307_v44  ;;  %vm311_vm4 = vcmp.gt.f32.partialorder %v307_v44, 0.0 }
 0x1ee   :  { %458 = vpow2.f32 %v316_v46 }
 0x1f7   :  { %v457_v47 = vpop.eup %456 }
 0x1f8   :  { %v318_v48 = vmul.f32 1.7580993, %v457_v47 }
 0x1fa   :  { %v365_v50 = vadd.f32 -1.7580993, %v318_v48 }
 0x1fb   :  { %v459_v51 = vpop.eup %458 }
 0x1fc   :  { %v322_v52 = vsel %vm310_vm3, %v312_v49, %v365_v50  ;;  %v319_v53 = vmul.f32 1.7580993, %v459_v51 }
 0x1fd   :  { %324 = vst [vmem:[#allocation8] sm:$0xff] %v322_v52 }
 0x1fe   :  { %v366_v55 = vadd.f32 -1.7580993, %v319_v53 }
 0x200   :  { %v323_v56 = vsel %vm311_vm4, %v313_v54, %v366_v55 }
 0x201   :  { %325 = vst [vmem:[#allocation8 + $0x8] sm:$0xff] %v323_v56 }
 0x202   :  { %531 = shalt.err (!%p528_p5)
}
 0x203   :  { %s554_s12 = smov 128   ;;  %s555_s13 = smov 8  }
 0x204   :  { %337 = dma.vmem_to_hbm [thread:$0]  %s332_s11, 256, %s609_s5, [#allocation4], %s554_s12, %s554_s12, %s555_s13  }
 0x205   :  { %544 = dma.done.wait [#allocation4], 256  }
 0x206   :  { %545 = vsyncadd [#allocation4], 4294967040 }
 0x207   :  { %341 = vsyncpa [#allocation3], 1 }
 0x208   :  { %342 = vsyncpa [#allocation6], 1 }
 0x209   :  { %343 = vsyncpa [#allocation4], 1 }

</bundles_post_ra>
